<compile_context>
chip_gen: v7x
topology: tpu7x:2x2x1
jax: 0.10.0
libtpu: 0.0.40
codegen_flags: <defaults>
</compile_context>

<pallas_src>
import jax
import jax.numpy as jnp
from jax.experimental import pallas as pl
from jax.experimental.pallas import tpu as pltpu

LANES = 128
SUBLANES = 8
VMEM_BUDGET_BYTES = 48 << 20  # conservative across v5e / v6e / v7x


def _fused_add4_coscos_kernel(a_ref, b_ref, c_ref, d_ref, o_ref):
    # Pure elementwise: 3 VPU adds + two EUP/VPU cos evaluations per element.
    x = a_ref[...] + b_ref[...] + c_ref[...] + d_ref[...]
    o_ref[...] = jnp.cos(jnp.cos(x))


def _slab_dims(padded_n):
    """Pick (rows, cols): cols the widest multiple of 128 (2048..128) such
    that rows = padded_n // cols is a multiple of 8."""
    for cols in (2048, 1024, 512, 256, 128):
        if padded_n % (SUBLANES * cols) == 0:
            return padded_n // cols, cols
    raise ValueError("padded_n must be a multiple of 1024")


def fused_add4_coscos(a, b, c, d, *, max_block_rows=1024):
    assert a.shape == b.shape == c.shape == d.shape
    assert a.dtype == b.dtype == c.dtype == d.dtype
    orig_shape = a.shape
    n = a.size
    itemsize = jnp.dtype(a.dtype).itemsize

    # Pad once (outside the kernel) up to a whole vreg so the slab tiles
    # cleanly. For the (2,4,16,16) shape pad == 0 and the reshape is a free
    # relayout of contiguous memory.
    pad = (-n) % (SUBLANES * LANES)
    rows, cols = _slab_dims(n + pad)

    def to_slab(x):
        flat = x.reshape(-1)
        if pad:
            flat = jnp.pad(flat, (0, pad))
        return flat.reshape(rows, cols)

    a2, b2, c2, d2 = (to_slab(x) for x in (a, b, c, d))
    slab_bytes = rows * cols * itemsize
    out_sds = jax.ShapeDtypeStruct((rows, cols), a.dtype)

    if 5 * slab_bytes <= VMEM_BUDGET_BYTES:
        # Small problem: whole arrays resident in VMEM, single kernel launch.
        vmem_spec = pl.BlockSpec(memory_space=pltpu.MemorySpace.VMEM)
        out2 = pl.pallas_call(
            _fused_add4_coscos_kernel,
            out_shape=out_sds,
            in_specs=[vmem_spec] * 4,
            out_specs=vmem_spec,
        )(a2, b2, c2, d2)
    else:
        # Large problem: big row tiles (memory-bound), capped so
        # 5 arrays x 2 buffers x tile fits the VMEM budget on every chip gen.
        tile_rows = max_block_rows
        while tile_rows > SUBLANES and (
            rows % tile_rows != 0
            or 5 * 2 * tile_rows * cols * itemsize > VMEM_BUDGET_BYTES
        ):
            tile_rows //= 2
        spec = pl.BlockSpec((tile_rows, cols), lambda i: (i, 0))
        out2 = pl.pallas_call(
            _fused_add4_coscos_kernel,
            out_shape=out_sds,
            grid=(rows // tile_rows,),
            in_specs=[spec] * 4,
            out_specs=spec,
            compiler_params=pltpu.CompilerParams(
                dimension_semantics=("parallel",),
                vmem_limit_bytes=VMEM_BUDGET_BYTES + (16 << 20),
            ),
        )(a2, b2, c2, d2)

    out = out2.reshape(-1)
    if pad:
        out = out[:n]
    return out.reshape(orig_shape)


if __name__ == "__main__":
    key = jax.random.PRNGKey(0)
    k0, k1, k2, k3 = jax.random.split(key, 4)
    shape = (2, 4, 16, 16)  # (B, C, H, W) conv-style tensor, small example
    a = jax.random.normal(k0, shape, dtype=jnp.float32)
    b = jax.random.normal(k1, shape, dtype=jnp.float32)
    c = jax.random.normal(k2, shape, dtype=jnp.float32)
    d = jax.random.normal(k3, shape, dtype=jnp.float32)

    fused = jax.jit(fused_add4_coscos)
    out = fused(a, b, c, d)
    out = jax.block_until_ready(out)

    ref = jnp.cos(jnp.cos(a + b + c + d))
    assert out.shape == shape
    assert out.dtype == a.dtype
    assert jnp.allclose(out, ref, atol=1e-6, rtol=1e-6)
    print("KERNEL_OK")
</pallas_src>

<mosaic_0001>
module attributes {stable_mosaic.version = 11 : i64} {
  func.func @_fused_add4_coscos_kernel(%arg0: memref<8x256xf32, #tpu.memory_space<vmem>>, %arg1: memref<8x256xf32, #tpu.memory_space<vmem>>, %arg2: memref<8x256xf32, #tpu.memory_space<vmem>>, %arg3: memref<8x256xf32, #tpu.memory_space<vmem>>, %arg4: memref<8x256xf32, #tpu.memory_space<vmem>>) attributes {dimension_semantics = [], scalar_prefetch = 0 : i64, scratch_operands = 0 : i64, tpu.core_type = #tpu.core_type<tc>} {
    %c0 = arith.constant 0 : index
    %c0_0 = arith.constant 0 : index
    %0 = vector.load %arg0[%c0, %c0_0] : memref<8x256xf32, #tpu.memory_space<vmem>>, vector<8x256xf32>
    %c0_1 = arith.constant 0 : index
    %c0_2 = arith.constant 0 : index
    %1 = vector.load %arg1[%c0_1, %c0_2] : memref<8x256xf32, #tpu.memory_space<vmem>>, vector<8x256xf32>
    %2 = arith.addf %0, %1 : vector<8x256xf32>
    %c0_3 = arith.constant 0 : index
    %c0_4 = arith.constant 0 : index
    %3 = vector.load %arg2[%c0_3, %c0_4] : memref<8x256xf32, #tpu.memory_space<vmem>>, vector<8x256xf32>
    %4 = arith.addf %2, %3 : vector<8x256xf32>
    %c0_5 = arith.constant 0 : index
    %c0_6 = arith.constant 0 : index
    %5 = vector.load %arg3[%c0_5, %c0_6] : memref<8x256xf32, #tpu.memory_space<vmem>>, vector<8x256xf32>
    %6 = arith.addf %4, %5 : vector<8x256xf32>
    %7 = math.cos %6 : vector<8x256xf32>
    %8 = math.cos %7 : vector<8x256xf32>
    %c0_7 = arith.constant 0 : index
    %c0_8 = arith.constant 0 : index
    %9 = vector.load %arg4[%c0_7, %c0_8] : memref<8x256xf32, #tpu.memory_space<vmem>>, vector<8x256xf32>
    tpu.vector_store %arg4[%c0_7, %c0_8], %8 {strides = array<i32>} : memref<8x256xf32, #tpu.memory_space<vmem>>, vector<8x256xf32>,
    return
  }
}

</mosaic_0001>

<bundles_post_ra>
// kernel: fused_add4_coscos.1
= control target key start
LH: loop header
LB: loop body
LE: loop exit
PB: predicated region body
PF: predicated region fallthrough
CT: control target
= control target key end

     0   :  { %v503_v36 = vmov 683565275   ;;  %v504_v38 = vmov 2475754826   ;;  %v505_v40 = vmov 2131351028   ;;  %s758_s0 = inlined_call_operand.vmem [shape: f32[8,256], index: 0, kind: input, shape index: {}]   ;;  %s759_s1 = inlined_call_operand.vmem [shape: f32[8,256], index: 1, kind: input, shape index: {}]   ;;  %s760_s2 = inlined_call_operand.vmem [shape: f32[8,256], index: 2, kind: input, shape index: {}]   ;;  %s761_s3 = inlined_call_operand.vmem [shape: f32[8,256], index: 3, kind: input, shape index: {}]   ;;  %s762_s4 = inlined_call_operand.vmem [shape: f32[8,256], index: 4, kind: output, shape index: {}]  }
   0x1   :  { %v17_v0 = vld [vmem:[%s758_s0] sm:$0xff]  ;;  %v18_v1 = vld [vmem:[%s758_s0 + $0x8] sm:$0xff]  ;;  %v506_v42 = vmov 2102212464   ;;  %v507_v44 = vmov 920167782  }
   0x2   :  { %v19_v2 = vld [vmem:[%s759_s1] sm:$0xff]  ;;  %v20_v3 = vld [vmem:[%s759_s1 + $0x8] sm:$0xff]  ;;  %v508_v52 = vmov 1326507024  }
   0x3   :  { %v21_v4 = vadd.f32 %v19_v2, %v17_v0  ;;  %v23_v5 = vld [vmem:[%s760_s2] sm:$0xff]  ;;  %v24_v6 = vld [vmem:[%s760_s2 + $0x8] sm:$0xff]  ;;  %v22_v7 = vadd.f32 %v20_v3, %v18_v1 }
   0x4   :  { %v27_v8 = vld [vmem:[%s761_s3] sm:$0xff]  ;;  %v28_v10 = vld [vmem:[%s761_s3 + $0x8] sm:$0xff] }
   0x5   :  { %v25_v9 = vadd.f32 %v23_v5, %v21_v4  ;;  %v26_v11 = vadd.f32 %v24_v6, %v22_v7 }
   0x7   :  { %v558_v12 = vadd.f32 %v27_v8, %v25_v9  ;;  %v560_v13 = vadd.f32 %v28_v10, %v26_v11 }
   0x9   :  { %v31_v14 = vand.u32 2147483647, %v558_v12  ;;  %v34_v15 = vand.u32 2139095040, %v558_v12  ;;  %v134_v16 = vand.u32 2147483647, %v560_v13  ;;  %v137_v17 = vand.u32 2139095040, %v560_v13 }
   0xa   :  { %vm33_vm14 = vcmp.lt.s32.totalorder %v558_v12, 0 }
   0xb   :  { %v35_v18 = vshrl.u32 %v34_v15, 23  ;;  %v38_v19 = vand.u32 8388607, %v31_v14  ;;  %v138_v20 = vshrl.u32 %v137_v17, 23  ;;  %v141_v21 = vand.u32 8388607, %v134_v16 }
   0xc   :  { %vm643_vm15 = vcmp.le.f32.partialorder %v31_v14, 0.7853982 }
   0xd   :  { %v449_v22 = vadd.s32 4294967169, %v35_v18  ;;  %v453_v23 = vadd.s32 4294967169, %v138_v20  ;;  %v39_v25 = vor.u32 8388608, %v38_v19  ;;  %v142_v26 = vor.u32 8388608, %v141_v21 }
   0xf   :  { %v41_v24 = vadd.s32 1, %v449_v22  ;;  %v144_v27 = vadd.s32 1, %v453_v23  ;;  %v570_v32 = vshll.u32 %v39_v25, 8  ;;  %v572_v34 = vshll.u32 %v142_v26, 8 }
  0x11   :  { %vm42_vm0 = vcmp.gt.s32.totalorder %v41_v24, 0  ;;  %vm145_vm1 = vcmp.gt.s32.totalorder %v144_v27, 0 }
  0x12   :  { %v43_v28 = vsel %vm42_vm0, %v41_v24, 0  ;;  %v146_v31 = vsel %vm145_vm1, %v144_v27, 0  ;;  %vm136_vm0 = vcmp.lt.s32.totalorder %v560_v13, 0  ;;  %vm655_vm1 = vcmp.le.f32.partialorder %v134_v16, 0.7853982 }
  0x13   :  { %v44_v29 = vshrl.u32 %v43_v28, 5  ;;  %v45_v30 = vand.u32 31, %v43_v28  ;;  %v148_v33 = vand.u32 31, %v146_v31  ;;  %v579_v46 = vshrl.u32 %v146_v31, 5 }
  0x15   :  { %v46_v35 = vsub.s32 32, %v45_v30  ;;  %v48_v37 = vshll.u32 %v503_v36, %v45_v30  ;;  %v51_v39 = vshll.u32 %v504_v38, %v45_v30  ;;  %v54_v41 = vshll.u32 %v505_v40, %v45_v30 }
  0x16   :  { %v57_v43 = vshll.u32 %v506_v42, %v45_v30  ;;  %v60_v45 = vshll.u32 %v507_v44, %v45_v30  ;;  %vm63_vm2 = vcmp.lt.s32.totalorder %v44_v29, 1  ;;  %vm64_vm3 = vcmp.lt.s32.totalorder %v44_v29, 2 }
  0x17   :  { %v47_v47 = vshrl.u32 %v503_v36, %v46_v35  ;;  %v49_v48 = vshrl.u32 %v504_v38, %v46_v35  ;;  %v52_v49 = vshrl.u32 %v505_v40, %v46_v35  ;;  %v55_v50 = vshrl.u32 %v506_v42, %v46_v35 }
  0x18   :  { %v58_v51 = vshrl.u32 %v507_v44, %v46_v35  ;;  %v61_v53 = vshrl.u32 %v508_v52, %v46_v35  ;;  %vm66_vm4 = vcmp.lt.s32.totalorder %v44_v29, 4  ;;  %v149_v57 = vsub.s32 32, %v148_v33 }
  0x19   :  { %v50_v54 = vor.u32 %v49_v48, %v48_v37  ;;  %v53_v55 = vor.u32 %v52_v49, %v51_v39  ;;  %v56_v56 = vor.u32 %v55_v50, %v54_v41  ;;  %vm65_vm5 = vcmp.lt.s32.totalorder %v44_v29, 3 }
  0x1a   :  { %v59_v58 = vor.u32 %v58_v51, %v57_v43  ;;  %v62_v59 = vor.u32 %v61_v53, %v60_v45  ;;  %v151_v60 = vshll.u32 %v503_v36, %v148_v33  ;;  %v154_v4 = vshll.u32 %v504_v38, %v148_v33 }
  0x1b   :  { %v67_v61 = vsel %vm63_vm2, %v47_v47, %v50_v54  ;;  %v68_v62 = vsel %vm66_vm4, %v56_v56, 2102212464  ;;  %v71_v63 = vsel %vm63_vm2, %v50_v54, %v53_v55  ;;  %v75_v0 = vsel %vm63_vm2, %v53_v55, %v56_v56 }
  0x1c   :  { %v69_v1 = vsel %vm65_vm5, %v53_v55, %v68_v62  ;;  %v72_v2 = vsel %vm66_vm4, %v59_v58, 920167782  ;;  %v76_v3 = vsel %vm66_vm4, %v62_v59, 1326507024  ;;  %v150_v7 = vshrl.u32 %v503_v36, %v149_v57 }
  0x1d   :  { %v73_v5 = vsel %vm65_vm5, %v56_v56, %v72_v2  ;;  %v77_v6 = vsel %vm65_vm5, %v59_v58, %v76_v3  ;;  %v152_v8 = vshrl.u32 %v504_v38, %v149_v57  ;;  %v70_v9 = vsel %vm64_vm3, %v67_v61, %v69_v1 }
  0x1e   :  { %v74_v10 = vsel %vm64_vm3, %v71_v63, %v73_v5  ;;  %v78_v11 = vsel %vm64_vm3, %v75_v0, %v77_v6  ;;  %v155_v15 = vshrl.u32 %v505_v40, %v149_v57  ;;  %v157_v23 = vshll.u32 %v505_v40, %v148_v33 }
  0x1f   :  { %v599_v17 = vmul.u32.u64.low %v570_v32, %v78_v11  ;;  %v600_v18 = vmul.u32.u64.high %v570_v32, %v78_v11, %v599_v17  ;;  %v603_v19 = vmul.u32.u64.low %v570_v32, %v74_v10  ;;  %v604_v20 = vmul.u32.u64.high %v570_v32, %v74_v10, %v603_v19 }
  0x20   :  { %v153_v21 = vor.u32 %v152_v8, %v151_v60  ;;  %v156_v22 = vor.u32 %v155_v15, %v154_v4  ;;  %v158_v24 = vshrl.u32 %v506_v42, %v149_v57  ;;  %v160_v25 = vshll.u32 %v506_v42, %v148_v33 }
  0x21   :  { %v161_v26 = vshrl.u32 %v507_v44, %v149_v57  ;;  %v163_v27 = vshll.u32 %v507_v44, %v148_v33  ;;  %v164_v28 = vshrl.u32 %v508_v52, %v149_v57  ;;  %v86_v29 = vmul.u32 %v570_v32, %v70_v9 }
  0x22   :  { %v159_v30 = vor.u32 %v158_v24, %v157_v23  ;;  %vm166_vm6 = vcmp.lt.s32.totalorder %v579_v46, 1  ;;  %vm167_vm7 = vcmp.lt.s32.totalorder %v579_v46, 2  ;;  %vm88_vm8 = vc.u32 %v600_v18, %v603_v19 }
  0x23   :  { %v89_v31 = vadd.s32 1, %v604_v20  ;;  %v162_v35 = vor.u32 %v161_v26, %v160_v25  ;;  %vm168_vm9 = vcmp.lt.s32.totalorder %v579_v46, 3  ;;  %v165_v37 = vor.u32 %v164_v28, %v163_v27 }
  0x24   :  { %vm169_vm10 = vcmp.lt.s32.totalorder %v579_v46, 4  ;;  %v170_v33 = vsel %vm166_vm6, %v150_v7, %v153_v21  ;;  %v174_v39 = vsel %vm166_vm6, %v153_v21, %v156_v22  ;;  %v178_v45 = vsel %vm166_vm6, %v156_v22, %v159_v30 }
  0x25   :  { %v90_v41 = vsel %vm88_vm8, %v89_v31, %v604_v20  ;;  %v171_v32 = vsel %vm169_vm10, %v159_v30, 2102212464  ;;  %v175_v43 = vsel %vm169_vm10, %v162_v35, 920167782  ;;  %v179_v50 = vsel %vm169_vm10, %v165_v37, 1326507024 }
  0x26   :  { %v91_v47 = vadd.s32 %v90_v41, %v86_v29  ;;  %v172_v48 = vsel %vm168_vm9, %v156_v22, %v171_v32  ;;  %v176_v49 = vsel %vm168_vm9, %v159_v30, %v175_v43  ;;  %v180_v54 = vsel %vm168_vm9, %v162_v35, %v179_v50 }
  0x27   :  { %v173_v51 = vsel %vm167_vm7, %v170_v33, %v172_v48  ;;  %v177_v53 = vsel %vm167_vm7, %v174_v39, %v176_v49  ;;  %v181_v56 = vsel %vm167_vm7, %v178_v45, %v180_v54  ;;  %v87_v11 = vadd.s32 %v603_v19, %v600_v18 }
  0x28   :  { %v92_v55 = vadd.s32 536870912, %v91_v47  ;;  %v627_v57 = vmul.u32.u64.low %v572_v34, %v177_v53  ;;  %v628_v58 = vmul.u32.u64.high %v572_v34, %v177_v53, %v627_v57  ;;  %v189_v62 = vmul.u32 %v572_v34, %v173_v51 }
  0x29   :  { %v631_v59 = vmul.u32.u64.low %v572_v34, %v181_v56  ;;  %v632_v60 = vmul.u32.u64.high %v572_v34, %v181_v56, %v631_v59  ;;  %vm123_vm5 = vweird.f32 %v558_v12  ;;  %vm226_vm9 = vweird.f32 %v560_v13 }
  0x2a   :  { %v93_v61 = vshrl.u32 %v92_v55, 30  ;;  %v192_v0 = vadd.s32 1, %v628_v58 }
  0x2b   :  { %vm191_vm11 = vc.u32 %v632_v60, %v627_v57  ;;  %v190_v31 = vadd.s32 %v627_v57, %v632_v60 }
  0x2c   :  { %v94_v63 = vshll.u32 %v93_v61, 30  ;;  %v193_v46 = vsel %vm191_vm11, %v192_v0, %v628_v58 }
  0x2d   :  { %v194_v2 = vadd.s32 %v193_v46, %v189_v62 }
  0x2e   :  { %v95_v1 = vsub.s32 %v91_v47, %v94_v63  ;;  %v117_v47 = vsub.s32 4, %v93_v61 }
  0x2f   :  { %v195_v4 = vadd.s32 536870912, %v194_v2 }
  0x30   :  { %v97_v3 = vsub.s32 0, %v95_v1  ;;  %v118_v55 = vsel %vm33_vm14, %v117_v47, %v93_v61 }
  0x31   :  { %v196_v6 = vshrl.u32 %v195_v4, 30  ;;  %v120_v14 = vsel %vm643_vm15, 0, %v118_v55 }
  0x32   :  { %v450_v5 = vmin.u32 %v97_v3, %v95_v1  ;;  %v124_v62 = vand.u32 3, %v120_v14 }
  0x33   :  { %v197_v8 = vshll.u32 %v196_v6, 30  ;;  %v220_v60 = vsub.s32 4, %v196_v6 }
  0x34   :  { %v99_v7 = vclz %v450_v5  ;;  %vm129_vm2 = vcmp.eq.s32.totalorder %v124_v62, 2  ;;  %vm126_vm3 = vcmp.eq.s32.totalorder %v124_v62, 0  ;;  %vm125_vm4 = vcmp.lt.s32.totalorder %v124_v62, 2 }
  0x35   :  { %v198_v10 = vsub.s32 %v194_v2, %v197_v8  ;;  %v221_v0 = vsel %vm136_vm0, %v220_v60, %v196_v6 }
  0x36   :  { %v451_v9 = vadd.s32 4294967294, %v99_v7  ;;  %v223_v3 = vsel %vm655_vm1, 0, %v221_v0 }
  0x37   :  { %v200_v15 = vsub.s32 0, %v198_v10  ;;  %v227_v8 = vand.u32 3, %v223_v3 }
  0x38   :  { %vm452_vm12 = vcmp.lt.s32.totalorder %v451_v9, 0 }
  0x39   :  { %v102_v34 = vsel %vm452_vm12, 0, %v451_v9  ;;  %v454_v22 = vmin.u32 %v200_v15, %v198_v10  ;;  %vm232_vm6 = vcmp.eq.s32.totalorder %v227_v8, 2  ;;  %vm229_vm7 = vcmp.eq.s32.totalorder %v227_v8, 0 }
  0x3a   :  { %v103_v17 = vsub.s32 32, %v102_v34  ;;  %v104_v20 = vshll.u32 %v95_v1, %v102_v34  ;;  %v107_v21 = vsub.s32 4294967266, %v102_v34  ;;  %vm228_vm8 = vcmp.lt.s32.totalorder %v227_v8, 2 }
  0x3b   :  { %v202_v25 = vclz %v454_v22 }
  0x3c   :  { %v105_v23 = vshrl.u32 %v87_v11, %v103_v17  ;;  %v108_v24 = vadd.s32 127, %v107_v21 }
  0x3d   :  { %v455_v28 = vadd.s32 4294967294, %v202_v25 }
  0x3e   :  { %v106_v26 = vor.u32 %v105_v23, %v104_v20  ;;  %v109_v27 = vshll.u32 %v108_v24, 23 }
  0x3f   :  { %vm456_vm13 = vcmp.lt.s32.totalorder %v455_v28, 0 }
  0x40   :  { %v110_v29 = vor.u32 4788187, %v109_v27  ;;  %v113_v30 = vcvt.s32.f32 %v106_v26  ;;  %v205_v18 = vsel %vm456_vm13, 0, %v455_v28 }
  0x41   :  { %v206_v19 = vsub.s32 32, %v205_v18  ;;  %v207_v37 = vshll.u32 %v198_v10, %v205_v18  ;;  %v210_v33 = vsub.s32 4294967266, %v205_v18 }
  0x42   :  { %v111_v35 = vand.u32 2147483647, %v110_v29 }
  0x43   :  { %v208_v41 = vshrl.u32 %v190_v31, %v206_v19  ;;  %v211_v32 = vadd.s32 127, %v210_v33 }
  0x44   :  { %v114_v39 = vmul.f32 %v113_v30, %v111_v35 }
  0x45   :  { %v209_v48 = vor.u32 %v208_v41, %v207_v37  ;;  %v212_v49 = vshll.u32 %v211_v32, 23 }
  0x46   :  { %v115_v45 = vxor.u32 2147483648, %v114_v39 }
  0x47   :  { %v213_v53 = vor.u32 4788187, %v212_v49  ;;  %v216_v54 = vcvt.s32.f32 %v209_v48 }
  0x48   :  { %v116_v50 = vsel %vm33_vm14, %v115_v45, %v114_v39 }
  0x49   :  { %v119_v51 = vsel %vm643_vm15, %v558_v12, %v116_v50  ;;  %v214_v56 = vand.u32 2147483647, %v213_v53 }
  0x4a   :  { %487 = vcosq.f32 %v119_v51 }
  0x4b   :  { %489 = vsinq.f32 %v119_v51  ;;  %v217_v57 = vmul.f32 %v216_v54, %v214_v56 }
  0x4d   :  { %v218_v59 = vxor.u32 2147483648, %v217_v57 }
  0x4f   :  { %v219_v63 = vsel %vm136_vm0, %v218_v59, %v217_v57 }
  0x50   :  { %v222_v61 = vsel %vm655_vm1, %v560_v13, %v219_v63 }
  0x51   :  { %491 = vcosq.f32 %v222_v61 }
  0x52   :  { %493 = vsinq.f32 %v222_v61 }
  0x54   :  { %v488_v1 = vpop.eup %487 }
  0x55   :  { %v490_v46 = vpop.eup %489  ;;  %v130_v2 = vxor.u32 2147483648, %v488_v1 }
  0x56   :  { %v127_v16 = vxor.u32 2147483648, %v490_v46 }
  0x57   :  { %v131_v4 = vsel %vm129_vm2, %v130_v2, %v490_v46 }
  0x58   :  { %v128_v5 = vsel %vm126_vm3, %v488_v1, %v127_v16 }
  0x59   :  { %v132_v7 = vsel %vm125_vm4, %v128_v5, %v131_v4 }
  0x5a   :  { %v665_v9 = vsel %vm123_vm5, nan, %v132_v7 }
  0x5b   :  { %v240_v6 = vand.u32 2139095040, %v665_v9  ;;  %v237_v10 = vand.u32 2147483647, %v665_v9  ;;  %v492_v11 = vpop.eup %491 }
  0x5c   :  { %v494_v15 = vpop.eup %493  ;;  %v233_v17 = vxor.u32 2147483648, %v492_v11 }
  0x5d   :  { %v241_v34 = vshrl.u32 %v240_v6, 23  ;;  %v230_v20 = vxor.u32 2147483648, %v494_v15  ;;  %v244_v22 = vand.u32 8388607, %v237_v10 }
  0x5e   :  { %v234_v12 = vsel %vm232_vm6, %v233_v17, %v494_v15 }
  0x5f   :  { %v457_v21 = vadd.s32 4294967169, %v241_v34  ;;  %v231_v23 = vsel %vm229_vm7, %v492_v11, %v230_v20  ;;  %v245_v27 = vor.u32 8388608, %v244_v22  ;;  %vm239_vm7 = vcmp.lt.s32.totalorder %v665_v9, 0 }
  0x60   :  { %v235_v25 = vsel %vm228_vm8, %v231_v23, %v234_v12  ;;  %vm728_vm8 = vcmp.le.f32.partialorder %v237_v10, 0.7853982 }
  0x61   :  { %v247_v24 = vadd.s32 1, %v457_v21  ;;  %v672_v26 = vsel %vm226_vm9, nan, %v235_v25  ;;  %v285_v32 = vshll.u32 %v245_v27, 8 }
  0x62   :  { %v340_v29 = vand.u32 2147483647, %v672_v26  ;;  %v343_v30 = vand.u32 2139095040, %v672_v26 }
  0x63   :  { %vm248_vm10 = vcmp.gt.s32.totalorder %v247_v24, 0 }
  0x64   :  { %v249_v28 = vsel %vm248_vm10, %v247_v24, 0  ;;  %v344_v18 = vshrl.u32 %v343_v30, 23  ;;  %v347_v43 = vand.u32 8388607, %v340_v29 }
  0x65   :  { %v251_v31 = vand.u32 31, %v249_v28  ;;  %v250_v35 = vshrl.u32 %v249_v28, 5 }
  0x66   :  { %v461_v56 = vadd.s32 4294967169, %v344_v18  ;;  %v348_v16 = vor.u32 8388608, %v347_v43 }
  0x67   :  { %v252_v13 = vsub.s32 32, %v251_v31  ;;  %v254_v19 = vshll.u32 %v503_v36, %v251_v31  ;;  %v257_v37 = vshll.u32 %v504_v38, %v251_v31  ;;  %v260_v33 = vshll.u32 %v505_v40, %v251_v31 }
  0x68   :  { %v263_v39 = vshll.u32 %v506_v42, %v251_v31  ;;  %v266_v41 = vshll.u32 %v507_v44, %v251_v31  ;;  %vm269_vm11 = vcmp.lt.s32.totalorder %v250_v35, 1  ;;  %vm272_vm12 = vcmp.lt.s32.totalorder %v250_v35, 4 }
  0x69   :  { %v253_v45 = vshrl.u32 %v503_v36, %v252_v13  ;;  %v255_v47 = vshrl.u32 %v504_v38, %v252_v13  ;;  %v258_v48 = vshrl.u32 %v505_v40, %v252_v13  ;;  %v261_v49 = vshrl.u32 %v506_v42, %v252_v13 }
  0x6a   :  { %v264_v50 = vshrl.u32 %v507_v44, %v252_v13  ;;  %v267_v51 = vshrl.u32 %v508_v52, %v252_v13  ;;  %vm270_vm13 = vcmp.lt.s32.totalorder %v250_v35, 2  ;;  %vm271_vm14 = vcmp.lt.s32.totalorder %v250_v35, 3 }
  0x6b   :  { %v256_v53 = vor.u32 %v255_v47, %v254_v19  ;;  %v259_v54 = vor.u32 %v258_v48, %v257_v37  ;;  %v262_v55 = vor.u32 %v261_v49, %v260_v33  ;;  %v350_v1 = vadd.s32 1, %v461_v56 }
  0x6c   :  { %v265_v14 = vor.u32 %v264_v50, %v263_v39  ;;  %v268_v57 = vor.u32 %v267_v51, %v266_v41  ;;  %v388_v20 = vshll.u32 %v348_v16, 8 }
  0x6d   :  { %v273_v58 = vsel %vm269_vm11, %v253_v45, %v256_v53  ;;  %v274_v59 = vsel %vm272_vm12, %v262_v55, 2102212464  ;;  %v277_v60 = vsel %vm269_vm11, %v256_v53, %v259_v54  ;;  %v281_v62 = vsel %vm269_vm11, %v259_v54, %v262_v55 }
  0x6e   :  { %v275_v63 = vsel %vm271_vm14, %v259_v54, %v274_v59  ;;  %v278_v61 = vsel %vm272_vm12, %v265_v14, 920167782  ;;  %v282_v0 = vsel %vm272_vm12, %v268_v57, 1326507024  ;;  %vm351_vm15 = vcmp.gt.s32.totalorder %v350_v1, 0 }
  0x6f   :  { %v279_v46 = vsel %vm271_vm14, %v262_v55, %v278_v61  ;;  %v283_v2 = vsel %vm271_vm14, %v265_v14, %v282_v0  ;;  %v276_v3 = vsel %vm270_vm13, %v273_v58, %v275_v63  ;;  %v352_v34 = vsel %vm351_vm15, %v350_v1, 0 }
  0x70   :  { %v280_v4 = vsel %vm270_vm13, %v277_v60, %v279_v46  ;;  %v284_v5 = vsel %vm270_vm13, %v281_v62, %v283_v2  ;;  %v354_v15 = vand.u32 31, %v352_v34  ;;  %v292_v17 = vmul.u32 %v285_v32, %v276_v3 }
  0x71   :  { %v689_v7 = vmul.u32.u64.low %v285_v32, %v284_v5  ;;  %v690_v8 = vmul.u32.u64.high %v285_v32, %v284_v5, %v689_v7  ;;  %v692_v6 = vmul.u32.u64.low %v285_v32, %v280_v4  ;;  %v693_v11 = vmul.u32.u64.high %v285_v32, %v280_v4, %v692_v6 }
  0x72   :  { %v353_v12 = vshrl.u32 %v352_v34, 5  ;;  %v355_v22 = vsub.s32 32, %v354_v15  ;;  %v357_v23 = vshll.u32 %v503_v36, %v354_v15  ;;  %v360_v24 = vshll.u32 %v504_v38, %v354_v15 }
  0x73   :  { %vm294_vm0 = vc.u32 %v690_v8, %v692_v6  ;;  %v295_v21 = vadd.s32 1, %v693_v11  ;;  %v363_v25 = vshll.u32 %v505_v40, %v354_v15  ;;  %v366_v27 = vshll.u32 %v506_v42, %v354_v15 }
  0x74   :  { %v356_v30 = vshrl.u32 %v503_v36, %v355_v22  ;;  %v358_v31 = vshrl.u32 %v504_v38, %v355_v22  ;;  %v361_v35 = vshrl.u32 %v505_v40, %v355_v22  ;;  %v364_v13 = vshrl.u32 %v506_v42, %v355_v22 }
  0x75   :  { %v296_v28 = vsel %vm294_vm0, %v295_v21, %v693_v11  ;;  %v367_v19 = vshrl.u32 %v507_v44, %v355_v22  ;;  %v369_v37 = vshll.u32 %v507_v44, %v354_v15  ;;  %v370_v41 = vshrl.u32 %v508_v52, %v355_v22 }
  0x76   :  { %v297_v18 = vadd.s32 %v296_v28, %v292_v17  ;;  %v359_v33 = vor.u32 %v358_v31, %v357_v23  ;;  %v362_v39 = vor.u32 %v361_v35, %v360_v24  ;;  %vm372_vm1 = vcmp.lt.s32.totalorder %v353_v12, 1 }
  0x77   :  { %v365_v43 = vor.u32 %v364_v13, %v363_v25  ;;  %v368_v45 = vor.u32 %v367_v19, %v366_v27  ;;  %vm373_vm2 = vcmp.lt.s32.totalorder %v353_v12, 2  ;;  %v371_v36 = vor.u32 %v370_v41, %v369_v37 }
  0x78   :  { %v298_v32 = vadd.s32 536870912, %v297_v18  ;;  %vm374_vm3 = vcmp.lt.s32.totalorder %v353_v12, 3  ;;  %vm375_vm4 = vcmp.lt.s32.totalorder %v353_v12, 4  ;;  %v376_v38 = vsel %vm372_vm1, %v356_v30, %v359_v33 }
  0x79   :  { %v377_v47 = vsel %vm375_vm4, %v365_v43, 2102212464  ;;  %v380_v42 = vsel %vm372_vm1, %v359_v33, %v362_v39  ;;  %v381_v48 = vsel %vm375_vm4, %v368_v45, 920167782  ;;  %v384_v44 = vsel %vm372_vm1, %v362_v39, %v365_v43 }
  0x7a   :  { %v299_v40 = vshrl.u32 %v298_v32, 30  ;;  %v378_v49 = vsel %vm374_vm3, %v362_v39, %v377_v47  ;;  %v382_v50 = vsel %vm374_vm3, %v365_v43, %v381_v48  ;;  %v385_v51 = vsel %vm375_vm4, %v371_v36, 1326507024 }
  0x7b   :  { %v383_v52 = vsel %vm373_vm2, %v380_v42, %v382_v50  ;;  %v386_v54 = vsel %vm374_vm3, %v368_v45, %v385_v51  ;;  %v379_v57 = vsel %vm373_vm2, %v376_v38, %v378_v49  ;;  %v293_v4 = vadd.s32 %v692_v6, %v690_v8 }
  0x7c   :  { %v300_v53 = vshll.u32 %v299_v40, 30  ;;  %v712_v55 = vmul.u32.u64.low %v388_v20, %v383_v52  ;;  %v713_v56 = vmul.u32.u64.high %v388_v20, %v383_v52, %v712_v55  ;;  %v387_v58 = vsel %vm373_vm2, %v384_v44, %v386_v54 }
  0x7d   :  { %v717_v59 = vmul.u32.u64.low %v388_v20, %v387_v58  ;;  %v718_v60 = vmul.u32.u64.high %v388_v20, %v387_v58, %v717_v59  ;;  %v395_v63 = vmul.u32 %v388_v20, %v379_v57  ;;  %v323_v13 = vsub.s32 4, %v299_v40 }
  0x7e   :  { %v301_v14 = vsub.s32 %v297_v18, %v300_v53  ;;  %v398_v61 = vadd.s32 1, %v713_v56  ;;  %vm740_vm11 = vcmp.le.f32.partialorder %v340_v29, 0.7853982  ;;  %vm342_vm12 = vcmp.lt.s32.totalorder %v672_v26, 0 }
  0x7f   :  { %vm397_vm5 = vc.u32 %v718_v60, %v712_v55  ;;  %v396_v19 = vadd.s32 %v712_v55, %v718_v60  ;;  %v324_v45 = vsel %vm239_vm7, %v323_v13, %v299_v40  ;;  %vm329_vm15 = vweird.f32 %v665_v9 }
  0x80   :  { %v303_v62 = vsub.s32 0, %v301_v14  ;;  %v399_v46 = vsel %vm397_vm5, %v398_v61, %v713_v56  ;;  %v326_v38 = vsel %vm728_vm8, 0, %v324_v45  ;;  %vm432_vm3 = vweird.f32 %v672_v26 }
  0x81   :  { %v400_v2 = vadd.s32 %v399_v46, %v395_v63  ;;  %v330_v50 = vand.u32 3, %v326_v38 }
  0x82   :  { %v458_v0 = vmin.u32 %v303_v62, %v301_v14 }
  0x83   :  { %v401_v3 = vadd.s32 536870912, %v400_v2  ;;  %vm335_vm10 = vcmp.eq.s32.totalorder %v330_v50, 2  ;;  %vm332_vm13 = vcmp.eq.s32.totalorder %v330_v50, 0  ;;  %vm331_vm14 = vcmp.lt.s32.totalorder %v330_v50, 2 }
  0x84   :  { %v305_v1 = vclz %v458_v0 }
  0x85   :  { %v402_v7 = vshrl.u32 %v401_v3, 30 }
  0x86   :  { %v459_v16 = vadd.s32 4294967294, %v305_v1 }
  0x87   :  { %v403_v17 = vshll.u32 %v402_v7, 30  ;;  %v426_v56 = vsub.s32 4, %v402_v7 }
  0x88   :  { %vm460_vm6 = vcmp.lt.s32.totalorder %v459_v16, 0 }
  0x89   :  { %v308_v5 = vsel %vm460_vm6, 0, %v459_v16  ;;  %v404_v12 = vsub.s32 %v400_v2, %v403_v17  ;;  %v427_v62 = vsel %vm342_vm12, %v426_v56, %v402_v7 }
  0x8a   :  { %v309_v11 = vsub.s32 32, %v308_v5  ;;  %v310_v34 = vshll.u32 %v301_v14, %v308_v5  ;;  %v313_v15 = vsub.s32 4294967266, %v308_v5  ;;  %v429_v61 = vsel %vm740_vm11, 0, %v427_v62 }
  0x8b   :  { %v406_v24 = vsub.s32 0, %v404_v12 }
  0x8c   :  { %v311_v20 = vshrl.u32 %v293_v4, %v309_v11  ;;  %v314_v21 = vadd.s32 127, %v313_v15 }
  0x8d   :  { %v462_v28 = vmin.u32 %v406_v24, %v404_v12 }
  0x8e   :  { %v312_v22 = vor.u32 %v311_v20, %v310_v34  ;;  %v315_v23 = vshll.u32 %v314_v21, 23 }
  0x8f   :  { %v408_v31 = vclz %v462_v28 }
  0x90   :  { %v316_v25 = vor.u32 4788187, %v315_v23  ;;  %v319_v27 = vcvt.s32.f32 %v312_v22 }
  0x91   :  { %v463_v8 = vadd.s32 4294967294, %v408_v31 }
  0x92   :  { %v317_v30 = vand.u32 2147483647, %v316_v25 }
  0x93   :  { %vm464_vm9 = vcmp.lt.s32.totalorder %v463_v8, 0 }
  0x94   :  { %v320_v35 = vmul.f32 %v319_v27, %v317_v30  ;;  %v411_v33 = vsel %vm464_vm9, 0, %v463_v8 }
  0x95   :  { %v412_v41 = vsub.s32 32, %v411_v33  ;;  %v413_v32 = vshll.u32 %v404_v12, %v411_v33  ;;  %v416_v43 = vsub.s32 4294967266, %v411_v33 }
  0x96   :  { %v321_v18 = vxor.u32 2147483648, %v320_v35 }
  0x97   :  { %v414_v10 = vshrl.u32 %v396_v19, %v412_v41  ;;  %v417_v36 = vadd.s32 127, %v416_v43 }
  0x98   :  { %v322_v37 = vsel %vm239_vm7, %v321_v18, %v320_v35 }
  0x99   :  { %v325_v39 = vsel %vm728_vm8, %v665_v9, %v322_v37  ;;  %v415_v47 = vor.u32 %v414_v10, %v413_v32  ;;  %v418_v42 = vshll.u32 %v417_v36, 23  ;;  %v433_v9 = vand.u32 3, %v429_v61 }
  0x9a   :  { %495 = vcosq.f32 %v325_v39 }
  0x9b   :  { %497 = vsinq.f32 %v325_v39  ;;  %v419_v48 = vor.u32 4788187, %v418_v42  ;;  %v422_v49 = vcvt.s32.f32 %v415_v47  ;;  %vm438_vm0 = vcmp.eq.s32.totalorder %v433_v9, 2 }
  0x9c   :  { %vm435_vm1 = vcmp.eq.s32.totalorder %v433_v9, 0  ;;  %vm434_vm2 = vcmp.lt.s32.totalorder %v433_v9, 2 }
  0x9d   :  { %v420_v44 = vand.u32 2147483647, %v419_v48 }
  0x9f   :  { %v423_v51 = vmul.f32 %v422_v49, %v420_v44 }
  0xa1   :  { %v424_v55 = vxor.u32 2147483648, %v423_v51 }
  0xa3   :  { %v425_v58 = vsel %vm342_vm12, %v424_v55, %v423_v51 }
  0xa4   :  { %v496_v53 = vpop.eup %495  ;;  %v428_v29 = vsel %vm740_vm11, %v672_v26, %v425_v58 }
  0xa5   :  { %v498_v52 = vpop.eup %497  ;;  %v336_v54 = vxor.u32 2147483648, %v496_v53  ;;  %499 = vcosq.f32 %v428_v29 }
  0xa6   :  { %v333_v14 = vxor.u32 2147483648, %v498_v52  ;;  %501 = vsinq.f32 %v428_v29 }
  0xa7   :  { %v337_v57 = vsel %vm335_vm10, %v336_v54, %v498_v52 }
  0xa8   :  { %v334_v59 = vsel %vm332_vm13, %v496_v53, %v333_v14 }
  0xa9   :  { %v338_v60 = vsel %vm331_vm14, %v334_v59, %v337_v57 }
  0xaa   :  { %v339_v63 = vsel %vm329_vm15, nan, %v338_v60 }
  0xab   :  { %443 = vst [vmem:[%s762_s4] sm:$0xff] %v339_v63 }
  0xaf   :  { %v500_v0 = vpop.eup %499 }
  0xb0   :  { %v502_v1 = vpop.eup %501  ;;  %v439_v46 = vxor.u32 2147483648, %v500_v0 }
  0xb1   :  { %v436_v2 = vxor.u32 2147483648, %v502_v1 }
  0xb2   :  { %v440_v16 = vsel %vm438_vm0, %v439_v46, %v502_v1 }
  0xb3   :  { %v437_v3 = vsel %vm435_vm1, %v500_v0, %v436_v2 }
  0xb4   :  { %v441_v4 = vsel %vm434_vm2, %v437_v3, %v440_v16 }
  0xb5   :  { %v442_v5 = vsel %vm432_vm3, nan, %v441_v4 }
  0xb6   :  { %444 = vst [vmem:[%s762_s4 + $0x8] sm:$0xff] %v442_v5 }

</bundles_post_ra>
